<compile_context>
chip_gen: v6e
topology: v6e:2x2x1
jax: 0.10.0
libtpu: 0.0.40
codegen_flags: <defaults>
</compile_context>

<pallas_src>
import functools

import jax
import jax.numpy as jnp
from jax import lax
from jax.experimental import pallas as pl
from jax.experimental.pallas import tpu as pltpu

BN_EPS = 1e-5


def _resblock_kernel(x_ref, w1_ref, w2_ref, g1_ref, b1_ref, g2_ref, b2_ref,
                     mask_ref, o_ref, xs_ref, patch_ref, act_ref,
                     *, n_batch, hw, width, c_real, c_pad):
    # x_ref     : (N, C, HW)          input, NCHW with spatial flattened
    # w*_ref    : (C_pad, 9*C_pad)    packed conv weights, columns (kh, kw, ci)
    # g*/b*_ref : (C_pad, 1)          BN gamma / beta (zero-padded rows)
    # mask_ref  : (9, N*HW)           per-tap border masks (H and W borders)
    # o_ref     : (N, C, HW)          output
    # xs_ref    : (C_pad, N*HW)       conv-input slab (batch on the lane axis)
    # patch_ref : (9*C_pad, N*HW)     im2col scratch -> single K=9*C_pad dot
    # act_ref   : (C_pad, N*HW)       conv-output slab
    L = n_batch * hw
    W = width
    inv_count = 1.0 / float(n_batch * hw)

    # Zero only the channel-pad rows; rows [:c_real] are fully rewritten before
    # every conv, so no full-buffer clear is needed.
    if c_pad > c_real:
        xs_ref[c_real:, :] = jnp.zeros((c_pad - c_real, L), jnp.float32)

    # Pack the whole batch into one (C_pad, N*HW) slab (lane-aligned segments).
    for n in range(n_batch):
        xs_ref[:c_real, n * hw:(n + 1) * hw] = x_ref[n]

    def conv3x3(w_ref):
        """3x3 / stride 1 / pad 1 conv of the whole batch slab -> (C_pad, L)."""
        src = xs_ref[...]                                    # (C_pad, L)
        for kh in range(3):
            for kw in range(3):
                t = kh * 3 + kw
                off = (kh - 1) * W + (kw - 1)
                if off == 0:
                    tap = src                                # center tap, no mask
                else:
                    # tap[p] = src[p + off]; wraps + image borders are killed
                    # by the precomputed mask row.
                    tap = pltpu.roll(src, (-off) % L, axis=1)
                    tap = tap * mask_ref[t:t + 1, :]
                patch_ref[t * c_pad:(t + 1) * c_pad, :] = tap   # aligned rows
        return jnp.dot(w_ref[...], patch_ref[...],
                       preferred_element_type=jnp.float32)

    def bn_affine(slab, g_ref, b_ref):
        """Two-pass train-mode BN stats folded into a single scale/shift."""
        mean = jnp.sum(slab, axis=1, keepdims=True) * inv_count
        d = slab - mean
        var = jnp.sum(d * d, axis=1, keepdims=True) * inv_count
        scale = g_ref[...] * lax.rsqrt(var + BN_EPS)
        shift = b_ref[...] - mean * scale
        return scale, shift

    # ---- conv1 -> BN1 -> ReLU (written back into the input slab) ----
    act_ref[...] = conv3x3(w1_ref)
    a1 = act_ref[...]
    scale1, shift1 = bn_affine(a1, g1_ref, b1_ref)
    xs_ref[...] = jnp.maximum(a1 * scale1 + shift1, 0.0)    # pad rows stay 0

    # ---- conv2 -> BN2 ----
    act_ref[...] = conv3x3(w2_ref)
    a2 = act_ref[...]
    scale2, shift2 = bn_affine(a2, g2_ref, b2_ref)

    # ---- BN2 apply + residual add + ReLU, lane-dense stores ----
    sc = scale2[:c_real]
    sh = shift2[:c_real]
    for n in range(n_batch):
        seg = a2[:c_real, n * hw:(n + 1) * hw]
        o_ref[n] = jnp.maximum(seg * sc + sh + x_ref[n], 0.0)


def res_block(x, conv1_w, bn1_gamma, bn1_beta, conv2_w, bn2_gamma, bn2_beta):
    """ResBlock forward (stride=1, no downsample), train-mode BatchNorm.

    x: (N, C, H, W) NCHW.  conv*_w: (C, C, 3, 3).  Returns (N, C, H, W).
    """
    N, C, H, W = x.shape
    assert conv1_w.shape == (C, C, 3, 3) and conv2_w.shape == (C, C, 3, 3), (
        "this ResBlock requires inplanes == planes and 3x3 kernels")
    # TODO(synk): stride != 1 and the optional downsample path are not
    # implemented (module default is stride=1, downsample=None).
    HW = H * W
    L = N * HW
    C_pad = ((C + 7) // 8) * 8                    # sublane-aligned channel rows

    x_flat = x.reshape(N, C, HW).astype(jnp.float32)          # pure reshape

    def pack_weight(w):
        # (O, I, 3, 3) -> (O, kh, kw, I) -> (O, 9, I), then pad to C_pad.
        w2 = jnp.transpose(w, (0, 2, 3, 1)).reshape(C, 9, C).astype(jnp.float32)
        wp = jnp.zeros((C_pad, 9, C_pad), jnp.float32).at[:C, :, :C].set(w2)
        return wp.reshape(C_pad, 9 * C_pad)

    def pack_affine(v):
        return jnp.zeros((C_pad, 1), jnp.float32).at[:C, 0].set(
            v.astype(jnp.float32))

    w1_2d = pack_weight(conv1_w)
    w2_2d = pack_weight(conv2_w)
    g1, b1 = pack_affine(bn1_gamma), pack_affine(bn1_beta)
    g2, b2 = pack_affine(bn2_gamma), pack_affine(bn2_beta)

    # Per-tap validity masks over the flattened (n, y, w) lane axis.  A tap
    # (dh, dw) is valid iff 0 <= y+dh < H and 0 <= w+dw < W; everything else
    # (H/W borders, cross-image wrap from the roll) is zeroed.
    p = jnp.arange(L, dtype=jnp.int32)
    q = p % HW
    yy = q // W
    ww = q % W
    rows = []
    for kh in range(3):
        for kw in range(3):
            dh, dw = kh - 1, kw - 1
            valid = ((yy + dh >= 0) & (yy + dh < H) &
                     (ww + dw >= 0) & (ww + dw < W))
            rows.append(valid.astype(jnp.float32))
    masks = jnp.stack(rows, axis=0)                           # (9, L)

    flops = 4 * 9 * C_pad * C_pad * L + 24 * C_pad * L
    bytes_accessed = 4 * (2 * N * C * HW + 2 * 9 * C_pad * C_pad
                          + 4 * C_pad + 9 * L)

    kernel = functools.partial(_resblock_kernel, n_batch=N, hw=HW, width=W,
                               c_real=C, c_pad=C_pad)
    out_flat = pl.pallas_call(
        kernel,
        out_shape=jax.ShapeDtypeStruct((N, C, HW), jnp.float32),
        in_specs=[pl.BlockSpec(memory_space=pltpu.MemorySpace.VMEM)] * 8,
        out_specs=pl.BlockSpec(memory_space=pltpu.MemorySpace.VMEM),
        scratch_shapes=[
            pltpu.VMEM((C_pad, L), jnp.float32),          # conv-input slab
            pltpu.VMEM((9 * C_pad, L), jnp.float32),      # im2col patches
            pltpu.VMEM((C_pad, L), jnp.float32),          # conv-output slab
        ],
        cost_estimate=pl.CostEstimate(flops=int(flops),
                                      transcendentals=int(2 * C_pad),
                                      bytes_accessed=int(bytes_accessed)),
    )(x_flat, w1_2d, w2_2d, g1, b1, g2, b2, masks)

    return out_flat.reshape(N, C, H, W)                       # pure reshape


def _reference(x, w1, g1, b1, w2, g2, b2):
    """Pure-JAX reference matching PyTorch ResBlock forward (train-mode BN)."""
    def conv(v, w):
        return lax.conv_general_dilated(
            v.astype(jnp.float32), w.astype(jnp.float32), (1, 1),
            ((1, 1), (1, 1)), dimension_numbers=("NCHW", "OIHW", "NCHW"))

    def bn(v, g, b):
        m = jnp.mean(v, axis=(0, 2, 3), keepdims=True)
        var = jnp.mean((v - m) ** 2, axis=(0, 2, 3), keepdims=True)
        vn = (v - m) * lax.rsqrt(var + BN_EPS)
        return vn * g.reshape(1, -1, 1, 1) + b.reshape(1, -1, 1, 1)

    out = jnp.maximum(bn(conv(x, w1), g1, b1), 0.0)
    out = bn(conv(out, w2), g2, b2)
    return jnp.maximum(out + x, 0.0)


if __name__ == "__main__":
    N, C, H, W = 2, 4, 16, 16   # inplanes == planes == 4, stride=1, no downsample

    key = jax.random.PRNGKey(0)
    ks = jax.random.split(key, 7)
    x = jax.random.normal(ks[0], (N, C, H, W), dtype=jnp.float32)
    w1 = jax.random.normal(ks[1], (C, C, 3, 3), dtype=jnp.float32) * 0.1
    w2 = jax.random.normal(ks[2], (C, C, 3, 3), dtype=jnp.float32) * 0.1
    g1 = 1.0 + 0.1 * jax.random.normal(ks[3], (C,), dtype=jnp.float32)
    b1 = 0.1 * jax.random.normal(ks[4], (C,), dtype=jnp.float32)
    g2 = 1.0 + 0.1 * jax.random.normal(ks[5], (C,), dtype=jnp.float32)
    b2 = 0.1 * jax.random.normal(ks[6], (C,), dtype=jnp.float32)

    out = jax.block_until_ready(res_block(x, w1, g1, b1, w2, g2, b2))
    ref = jax.block_until_ready(_reference(x, w1, g1, b1, w2, g2, b2))

    assert out.shape == (N, C, H, W), out.shape
    max_err = float(jnp.max(jnp.abs(out - ref)))
    assert jnp.allclose(out, ref, atol=1e-3, rtol=1e-3), max_err
    print("KERNEL_OK")
</pallas_src>

<mosaic_0001>
module attributes {stable_mosaic.version = 11 : i64} {
  func.func @_resblock_kernel(%arg0: memref<2x4x256xf32, #tpu.memory_space<vmem>>, %arg1: memref<8x72xf32, #tpu.memory_space<vmem>>, %arg2: memref<8x72xf32, #tpu.memory_space<vmem>>, %arg3: memref<8x1xf32, #tpu.memory_space<vmem>>, %arg4: memref<8x1xf32, #tpu.memory_space<vmem>>, %arg5: memref<8x1xf32, #tpu.memory_space<vmem>>, %arg6: memref<8x1xf32, #tpu.memory_space<vmem>>, %arg7: memref<9x512xf32, #tpu.memory_space<vmem>>, %arg8: memref<2x4x256xf32, #tpu.memory_space<vmem>>, %arg9: memref<8x512xf32, #tpu.memory_space<vmem>>, %arg10: memref<72x512xf32, #tpu.memory_space<vmem>>, %arg11: memref<8x512xf32, #tpu.memory_space<vmem>>) attributes {dimension_semantics = [], scalar_prefetch = 0 : i64, scratch_operands = 3 : i64, tpu.core_type = #tpu.core_type<tc>} {
    %cst = arith.constant 0.000000e+00 : f32
    %0 = vector.broadcast %cst : f32 to vector<4x512xf32>
    %c4 = arith.constant 4 : index
    %c0 = arith.constant 0 : index
    %1 = vector.load %arg9[%c4, %c0] : memref<8x512xf32, #tpu.memory_space<vmem>>, vector<4x512xf32>
    tpu.vector_store %arg9[%c4, %c0], %0 {strides = array<i32>} : memref<8x512xf32, #tpu.memory_space<vmem>>, vector<4x512xf32>,
    %c0_0 = arith.constant 0 : index
    %c0_1 = arith.constant 0 : index
    %c0_2 = arith.constant 0 : index
    %2 = vector.load %arg0[%c0_0, %c0_1, %c0_2] : memref<2x4x256xf32, #tpu.memory_space<vmem>>, vector<1x4x256xf32>
    %3 = vector.shape_cast %2 : vector<1x4x256xf32> to vector<4x256xf32>
    %c0_3 = arith.constant 0 : index
    %c0_4 = arith.constant 0 : index
    %4 = vector.load %arg9[%c0_3, %c0_4] : memref<8x512xf32, #tpu.memory_space<vmem>>, vector<4x256xf32>
    tpu.vector_store %arg9[%c0_3, %c0_4], %3 {strides = array<i32>} : memref<8x512xf32, #tpu.memory_space<vmem>>, vector<4x256xf32>,
    %c1 = arith.constant 1 : index
    %c0_5 = arith.constant 0 : index
    %c0_6 = arith.constant 0 : index
    %5 = vector.load %arg0[%c1, %c0_5, %c0_6] : memref<2x4x256xf32, #tpu.memory_space<vmem>>, vector<1x4x256xf32>
    %6 = vector.shape_cast %5 : vector<1x4x256xf32> to vector<4x256xf32>
    %c0_7 = arith.constant 0 : index
    %c256 = arith.constant 256 : index
    %7 = vector.load %arg9[%c0_7, %c256] : memref<8x512xf32, #tpu.memory_space<vmem>>, vector<4x256xf32>
    tpu.vector_store %arg9[%c0_7, %c256], %6 {strides = array<i32>} : memref<8x512xf32, #tpu.memory_space<vmem>>, vector<4x256xf32>,
    %c0_8 = arith.constant 0 : index
    %c0_9 = arith.constant 0 : index
    %8 = vector.load %arg9[%c0_8, %c0_9] : memref<8x512xf32, #tpu.memory_space<vmem>>, vector<8x512xf32>
    %c17_i32 = arith.constant 17 : i32
    %9 = tpu.dynamic_rotate %8 by %c17_i32 dim 1 : vector<8x512xf32>, i32 -> vector<8x512xf32>
    %c0_10 = arith.constant 0 : index
    %c0_11 = arith.constant 0 : index
    %10 = vector.load %arg7[%c0_10, %c0_11] : memref<9x512xf32, #tpu.memory_space<vmem>>, vector<1x512xf32>
    %11 = vector.broadcast %10 : vector<1x512xf32> to vector<8x512xf32>
    %12 = arith.mulf %9, %11 : vector<8x512xf32>
    %c0_12 = arith.constant 0 : index
    %c0_13 = arith.constant 0 : index
    %13 = vector.load %arg10[%c0_12, %c0_13] : memref<72x512xf32, #tpu.memory_space<vmem>>, vector<8x512xf32>
    tpu.vector_store %arg10[%c0_12, %c0_13], %12 {strides = array<i32>} : memref<72x512xf32, #tpu.memory_space<vmem>>, vector<8x512xf32>,
    %c16_i32 = arith.constant 16 : i32
    %14 = tpu.dynamic_rotate %8 by %c16_i32 dim 1 : vector<8x512xf32>, i32 -> vector<8x512xf32>
    %c1_14 = arith.constant 1 : index
    %c0_15 = arith.constant 0 : index
    %15 = vector.load %arg7[%c1_14, %c0_15] : memref<9x512xf32, #tpu.memory_space<vmem>>, vector<1x512xf32>
    %16 = vector.broadcast %15 : vector<1x512xf32> to vector<8x512xf32>
    %17 = arith.mulf %14, %16 : vector<8x512xf32>
    %c8 = arith.constant 8 : index
    %c0_16 = arith.constant 0 : index
    %18 = vector.load %arg10[%c8, %c0_16] : memref<72x512xf32, #tpu.memory_space<vmem>>, vector<8x512xf32>
    tpu.vector_store %arg10[%c8, %c0_16], %17 {strides = array<i32>} : memref<72x512xf32, #tpu.memory_space<vmem>>, vector<8x512xf32>,
    %c15_i32 = arith.constant 15 : i32
    %19 = tpu.dynamic_rotate %8 by %c15_i32 dim 1 : vector<8x512xf32>, i32 -> vector<8x512xf32>
    %c2 = arith.constant 2 : index
    %c0_17 = arith.constant 0 : index
    %20 = vector.load %arg7[%c2, %c0_17] : memref<9x512xf32, #tpu.memory_space<vmem>>, vector<1x512xf32>
    %21 = vector.broadcast %20 : vector<1x512xf32> to vector<8x512xf32>
    %22 = arith.mulf %19, %21 : vector<8x512xf32>
    %c16 = arith.constant 16 : index
    %c0_18 = arith.constant 0 : index
    %23 = vector.load %arg10[%c16, %c0_18] : memref<72x512xf32, #tpu.memory_space<vmem>>, vector<8x512xf32>
    tpu.vector_store %arg10[%c16, %c0_18], %22 {strides = array<i32>} : memref<72x512xf32, #tpu.memory_space<vmem>>, vector<8x512xf32>,
    %c1_i32 = arith.constant 1 : i32
    %24 = tpu.dynamic_rotate %8 by %c1_i32 dim 1 : vector<8x512xf32>, i32 -> vector<8x512xf32>
    %c3 = arith.constant 3 : index
    %c0_19 = arith.constant 0 : index
    %25 = vector.load %arg7[%c3, %c0_19] : memref<9x512xf32, #tpu.memory_space<vmem>>, vector<1x512xf32>
    %26 = vector.broadcast %25 : vector<1x512xf32> to vector<8x512xf32>
    %27 = arith.mulf %24, %26 : vector<8x512xf32>
    %c24 = arith.constant 24 : index
    %c0_20 = arith.constant 0 : index
    %28 = vector.load %arg10[%c24, %c0_20] : memref<72x512xf32, #tpu.memory_space<vmem>>, vector<8x512xf32>
    tpu.vector_store %arg10[%c24, %c0_20], %27 {strides = array<i32>} : memref<72x512xf32, #tpu.memory_space<vmem>>, vector<8x512xf32>,
    %c32 = arith.constant 32 : index
    %c0_21 = arith.constant 0 : index
    %29 = vector.load %arg10[%c32, %c0_21] : memref<72x512xf32, #tpu.memory_space<vmem>>, vector<8x512xf32>
    tpu.vector_store %arg10[%c32, %c0_21], %8 {strides = array<i32>} : memref<72x512xf32, #tpu.memory_space<vmem>>, vector<8x512xf32>,
    %c511_i32 = arith.constant 511 : i32
    %30 = tpu.dynamic_rotate %8 by %c511_i32 dim 1 : vector<8x512xf32>, i32 -> vector<8x512xf32>
    %c5 = arith.constant 5 : index
    %c0_22 = arith.constant 0 : index
    %31 = vector.load %arg7[%c5, %c0_22] : memref<9x512xf32, #tpu.memory_space<vmem>>, vector<1x512xf32>
    %32 = vector.broadcast %31 : vector<1x512xf32> to vector<8x512xf32>
    %33 = arith.mulf %30, %32 : vector<8x512xf32>
    %c40 = arith.constant 40 : index
    %c0_23 = arith.constant 0 : index
    %34 = vector.load %arg10[%c40, %c0_23] : memref<72x512xf32, #tpu.memory_space<vmem>>, vector<8x512xf32>
    tpu.vector_store %arg10[%c40, %c0_23], %33 {strides = array<i32>} : memref<72x512xf32, #tpu.memory_space<vmem>>, vector<8x512xf32>,
    %c497_i32 = arith.constant 497 : i32
    %35 = tpu.dynamic_rotate %8 by %c497_i32 dim 1 : vector<8x512xf32>, i32 -> vector<8x512xf32>
    %c6 = arith.constant 6 : index
    %c0_24 = arith.constant 0 : index
    %36 = vector.load %arg7[%c6, %c0_24] : memref<9x512xf32, #tpu.memory_space<vmem>>, vector<1x512xf32>
    %37 = vector.broadcast %36 : vector<1x512xf32> to vector<8x512xf32>
    %38 = arith.mulf %35, %37 : vector<8x512xf32>
    %c48 = arith.constant 48 : index
    %c0_25 = arith.constant 0 : index
    %39 = vector.load %arg10[%c48, %c0_25] : memref<72x512xf32, #tpu.memory_space<vmem>>, vector<8x512xf32>
    tpu.vector_store %arg10[%c48, %c0_25], %38 {strides = array<i32>} : memref<72x512xf32, #tpu.memory_space<vmem>>, vector<8x512xf32>,
    %c496_i32 = arith.constant 496 : i32
    %40 = tpu.dynamic_rotate %8 by %c496_i32 dim 1 : vector<8x512xf32>, i32 -> vector<8x512xf32>
    %c7 = arith.constant 7 : index
    %c0_26 = arith.constant 0 : index
    %41 = vector.load %arg7[%c7, %c0_26] : memref<9x512xf32, #tpu.memory_space<vmem>>, vector<1x512xf32>
    %42 = vector.broadcast %41 : vector<1x512xf32> to vector<8x512xf32>
    %43 = arith.mulf %40, %42 : vector<8x512xf32>
    %c56 = arith.constant 56 : index
    %c0_27 = arith.constant 0 : index
    %44 = vector.load %arg10[%c56, %c0_27] : memref<72x512xf32, #tpu.memory_space<vmem>>, vector<8x512xf32>
    tpu.vector_store %arg10[%c56, %c0_27], %43 {strides = array<i32>} : memref<72x512xf32, #tpu.memory_space<vmem>>, vector<8x512xf32>,
    %c495_i32 = arith.constant 495 : i32
    %45 = tpu.dynamic_rotate %8 by %c495_i32 dim 1 : vector<8x512xf32>, i32 -> vector<8x512xf32>
    %c8_28 = arith.constant 8 : index
    %c0_29 = arith.constant 0 : index
    %46 = vector.load %arg7[%c8_28, %c0_29] : memref<9x512xf32, #tpu.memory_space<vmem>>, vector<1x512xf32>
    %47 = vector.broadcast %46 : vector<1x512xf32> to vector<8x512xf32>
    %48 = arith.mulf %45, %47 : vector<8x512xf32>
    %c64 = arith.constant 64 : index
    %c0_30 = arith.constant 0 : index
    %49 = vector.load %arg10[%c64, %c0_30] : memref<72x512xf32, #tpu.memory_space<vmem>>, vector<8x512xf32>
    tpu.vector_store %arg10[%c64, %c0_30], %48 {strides = array<i32>} : memref<72x512xf32, #tpu.memory_space<vmem>>, vector<8x512xf32>,
    %c0_31 = arith.constant 0 : index
    %c0_32 = arith.constant 0 : index
    %50 = vector.load %arg1[%c0_31, %c0_32] : memref<8x72xf32, #tpu.memory_space<vmem>>, vector<8x72xf32>
    %c0_33 = arith.constant 0 : index
    %c0_34 = arith.constant 0 : index
    %51 = vector.load %arg10[%c0_33, %c0_34] : memref<72x512xf32, #tpu.memory_space<vmem>>, vector<72x512xf32>
    %cst_35 = arith.constant dense<0.000000e+00> : vector<8x512xf32>
    %52 = tpu.matmul %50, %51, %cst_35 {dimension_numbers = #tpu.dot_dimension_numbers<[1], [0], [0], [1], [0, 0, 1, 1], [], []>} : vector<8x72xf32>, vector<72x512xf32>, vector<8x512xf32> -> vector<8x512xf32>
    %c0_36 = arith.constant 0 : index
    %c0_37 = arith.constant 0 : index
    %53 = vector.load %arg11[%c0_36, %c0_37] : memref<8x512xf32, #tpu.memory_space<vmem>>, vector<8x512xf32>
    tpu.vector_store %arg11[%c0_36, %c0_37], %52 {strides = array<i32>} : memref<8x512xf32, #tpu.memory_space<vmem>>, vector<8x512xf32>,
    %c0_38 = arith.constant 0 : index
    %c0_39 = arith.constant 0 : index
    %54 = vector.load %arg11[%c0_38, %c0_39] : memref<8x512xf32, #tpu.memory_space<vmem>>, vector<8x512xf32>
    %cst_40 = arith.constant dense<0.000000e+00> : vector<8xf32>
    %55 = vector.multi_reduction <add>, %54, %cst_40 [1] : vector<8x512xf32> to vector<8xf32>
    %56 = vector.shape_cast %55 : vector<8xf32> to vector<8x1xf32>
    %cst_41 = arith.constant 0.001953125 : f32
    %57 = vector.broadcast %cst_41 : f32 to vector<8x1xf32>
    %58 = arith.mulf %56, %57 : vector<8x1xf32>
    %59 = vector.broadcast %58 : vector<8x1xf32> to vector<8x512xf32>
    %60 = arith.subf %54, %59 : vector<8x512xf32>
    %61 = arith.mulf %60, %60 : vector<8x512xf32>
    %cst_42 = arith.constant dense<0.000000e+00> : vector<8xf32>
    %62 = vector.multi_reduction <add>, %61, %cst_42 [1] : vector<8x512xf32> to vector<8xf32>
    %63 = vector.shape_cast %62 : vector<8xf32> to vector<8x1xf32>
    %cst_43 = arith.constant 0.001953125 : f32
    %64 = vector.broadcast %cst_43 : f32 to vector<8x1xf32>
    %65 = arith.mulf %63, %64 : vector<8x1xf32>
    %c0_44 = arith.constant 0 : index
    %c0_45 = arith.constant 0 : index
    %66 = vector.load %arg3[%c0_44, %c0_45] : memref<8x1xf32, #tpu.memory_space<vmem>>, vector<8x1xf32>
    %cst_46 = arith.constant 9.99999974E-6 : f32
    %67 = vector.broadcast %cst_46 : f32 to vector<8x1xf32>
    %68 = arith.addf %65, %67 : vector<8x1xf32>
    %69 = math.rsqrt %68 : vector<8x1xf32>
    %70 = arith.mulf %66, %69 : vector<8x1xf32>
    %c0_47 = arith.constant 0 : index
    %c0_48 = arith.constant 0 : index
    %71 = vector.load %arg4[%c0_47, %c0_48] : memref<8x1xf32, #tpu.memory_space<vmem>>, vector<8x1xf32>
    %72 = arith.mulf %58, %70 : vector<8x1xf32>
    %73 = arith.subf %71, %72 : vector<8x1xf32>
    %74 = vector.broadcast %70 : vector<8x1xf32> to vector<8x512xf32>
    %75 = arith.mulf %54, %74 : vector<8x512xf32>
    %76 = vector.broadcast %73 : vector<8x1xf32> to vector<8x512xf32>
    %77 = arith.addf %75, %76 : vector<8x512xf32>
    %cst_49 = arith.constant 0.000000e+00 : f32
    %78 = vector.broadcast %cst_49 : f32 to vector<8x512xf32>
    %79 = arith.maximumf %77, %78 : vector<8x512xf32>
    %c0_50 = arith.constant 0 : index
    %c0_51 = arith.constant 0 : index
    %80 = vector.load %arg9[%c0_50, %c0_51] : memref<8x512xf32, #tpu.memory_space<vmem>>, vector<8x512xf32>
    tpu.vector_store %arg9[%c0_50, %c0_51], %79 {strides = array<i32>} : memref<8x512xf32, #tpu.memory_space<vmem>>, vector<8x512xf32>,
    %c0_52 = arith.constant 0 : index
    %c0_53 = arith.constant 0 : index
    %81 = vector.load %arg9[%c0_52, %c0_53] : memref<8x512xf32, #tpu.memory_space<vmem>>, vector<8x512xf32>
    %c17_i32_54 = arith.constant 17 : i32
    %82 = tpu.dynamic_rotate %81 by %c17_i32_54 dim 1 : vector<8x512xf32>, i32 -> vector<8x512xf32>
    %c0_55 = arith.constant 0 : index
    %c0_56 = arith.constant 0 : index
    %83 = vector.load %arg7[%c0_55, %c0_56] : memref<9x512xf32, #tpu.memory_space<vmem>>, vector<1x512xf32>
    %84 = vector.broadcast %83 : vector<1x512xf32> to vector<8x512xf32>
    %85 = arith.mulf %82, %84 : vector<8x512xf32>
    %c0_57 = arith.constant 0 : index
    %c0_58 = arith.constant 0 : index
    %86 = vector.load %arg10[%c0_57, %c0_58] : memref<72x512xf32, #tpu.memory_space<vmem>>, vector<8x512xf32>
    tpu.vector_store %arg10[%c0_57, %c0_58], %85 {strides = array<i32>} : memref<72x512xf32, #tpu.memory_space<vmem>>, vector<8x512xf32>,
    %c16_i32_59 = arith.constant 16 : i32
    %87 = tpu.dynamic_rotate %81 by %c16_i32_59 dim 1 : vector<8x512xf32>, i32 -> vector<8x512xf32>
    %c1_60 = arith.constant 1 : index
    %c0_61 = arith.constant 0 : index
    %88 = vector.load %arg7[%c1_60, %c0_61] : memref<9x512xf32, #tpu.memory_space<vmem>>, vector<1x512xf32>
    %89 = vector.broadcast %88 : vector<1x512xf32> to vector<8x512xf32>
    %90 = arith.mulf %87, %89 : vector<8x512xf32>
    %c8_62 = arith.constant 8 : index
    %c0_63 = arith.constant 0 : index
    %91 = vector.load %arg10[%c8_62, %c0_63] : memref<72x512xf32, #tpu.memory_space<vmem>>, vector<8x512xf32>
    tpu.vector_store %arg10[%c8_62, %c0_63], %90 {strides = array<i32>} : memref<72x512xf32, #tpu.memory_space<vmem>>, vector<8x512xf32>,
    %c15_i32_64 = arith.constant 15 : i32
    %92 = tpu.dynamic_rotate %81 by %c15_i32_64 dim 1 : vector<8x512xf32>, i32 -> vector<8x512xf32>
    %c2_65 = arith.constant 2 : index
    %c0_66 = arith.constant 0 : index
    %93 = vector.load %arg7[%c2_65, %c0_66] : memref<9x512xf32, #tpu.memory_space<vmem>>, vector<1x512xf32>
    %94 = vector.broadcast %93 : vector<1x512xf32> to vector<8x512xf32>
    %95 = arith.mulf %92, %94 : vector<8x512xf32>
    %c16_67 = arith.constant 16 : index
    %c0_68 = arith.constant 0 : index
    %96 = vector.load %arg10[%c16_67, %c0_68] : memref<72x512xf32, #tpu.memory_space<vmem>>, vector<8x512xf32>
    tpu.vector_store %arg10[%c16_67, %c0_68], %95 {strides = array<i32>} : memref<72x512xf32, #tpu.memory_space<vmem>>, vector<8x512xf32>,
    %c1_i32_69 = arith.constant 1 : i32
    %97 = tpu.dynamic_rotate %81 by %c1_i32_69 dim 1 : vector<8x512xf32>, i32 -> vector<8x512xf32>
    %c3_70 = arith.constant 3 : index
    %c0_71 = arith.constant 0 : index
    %98 = vector.load %arg7[%c3_70, %c0_71] : memref<9x512xf32, #tpu.memory_space<vmem>>, vector<1x512xf32>
    %99 = vector.broadcast %98 : vector<1x512xf32> to vector<8x512xf32>
    %100 = arith.mulf %97, %99 : vector<8x512xf32>
    %c24_72 = arith.constant 24 : index
    %c0_73 = arith.constant 0 : index
    %101 = vector.load %arg10[%c24_72, %c0_73] : memref<72x512xf32, #tpu.memory_space<vmem>>, vector<8x512xf32>
    tpu.vector_store %arg10[%c24_72, %c0_73], %100 {strides = array<i32>} : memref<72x512xf32, #tpu.memory_space<vmem>>, vector<8x512xf32>,
    %c32_74 = arith.constant 32 : index
    %c0_75 = arith.constant 0 : index
    %102 = vector.load %arg10[%c32_74, %c0_75] : memref<72x512xf32, #tpu.memory_space<vmem>>, vector<8x512xf32>
    tpu.vector_store %arg10[%c32_74, %c0_75], %81 {strides = array<i32>} : memref<72x512xf32, #tpu.memory_space<vmem>>, vector<8x512xf32>,
    %c511_i32_76 = arith.constant 511 : i32
    %103 = tpu.dynamic_rotate %81 by %c511_i32_76 dim 1 : vector<8x512xf32>, i32 -> vector<8x512xf32>
    %c5_77 = arith.constant 5 : index
    %c0_78 = arith.constant 0 : index
    %104 = vector.load %arg7[%c5_77, %c0_78] : memref<9x512xf32, #tpu.memory_space<vmem>>, vector<1x512xf32>
    %105 = vector.broadcast %104 : vector<1x512xf32> to vector<8x512xf32>
    %106 = arith.mulf %103, %105 : vector<8x512xf32>
    %c40_79 = arith.constant 40 : index
    %c0_80 = arith.constant 0 : index
    %107 = vector.load %arg10[%c40_79, %c0_80] : memref<72x512xf32, #tpu.memory_space<vmem>>, vector<8x512xf32>
    tpu.vector_store %arg10[%c40_79, %c0_80], %106 {strides = array<i32>} : memref<72x512xf32, #tpu.memory_space<vmem>>, vector<8x512xf32>,
    %c497_i32_81 = arith.constant 497 : i32
    %108 = tpu.dynamic_rotate %81 by %c497_i32_81 dim 1 : vector<8x512xf32>, i32 -> vector<8x512xf32>
    %c6_82 = arith.constant 6 : index
    %c0_83 = arith.constant 0 : index
    %109 = vector.load %arg7[%c6_82, %c0_83] : memref<9x512xf32, #tpu.memory_space<vmem>>, vector<1x512xf32>
    %110 = vector.broadcast %109 : vector<1x512xf32> to vector<8x512xf32>
    %111 = arith.mulf %108, %110 : vector<8x512xf32>
    %c48_84 = arith.constant 48 : index
    %c0_85 = arith.constant 0 : index
    %112 = vector.load %arg10[%c48_84, %c0_85] : memref<72x512xf32, #tpu.memory_space<vmem>>, vector<8x512xf32>
    tpu.vector_store %arg10[%c48_84, %c0_85], %111 {strides = array<i32>} : memref<72x512xf32, #tpu.memory_space<vmem>>, vector<8x512xf32>,
    %c496_i32_86 = arith.constant 496 : i32
    %113 = tpu.dynamic_rotate %81 by %c496_i32_86 dim 1 : vector<8x512xf32>, i32 -> vector<8x512xf32>
    %c7_87 = arith.constant 7 : index
    %c0_88 = arith.constant 0 : index
    %114 = vector.load %arg7[%c7_87, %c0_88] : memref<9x512xf32, #tpu.memory_space<vmem>>, vector<1x512xf32>
    %115 = vector.broadcast %114 : vector<1x512xf32> to vector<8x512xf32>
    %116 = arith.mulf %113, %115 : vector<8x512xf32>
    %c56_89 = arith.constant 56 : index
    %c0_90 = arith.constant 0 : index
    %117 = vector.load %arg10[%c56_89, %c0_90] : memref<72x512xf32, #tpu.memory_space<vmem>>, vector<8x512xf32>
    tpu.vector_store %arg10[%c56_89, %c0_90], %116 {strides = array<i32>} : memref<72x512xf32, #tpu.memory_space<vmem>>, vector<8x512xf32>,
    %c495_i32_91 = arith.constant 495 : i32
    %118 = tpu.dynamic_rotate %81 by %c495_i32_91 dim 1 : vector<8x512xf32>, i32 -> vector<8x512xf32>
    %c8_92 = arith.constant 8 : index
    %c0_93 = arith.constant 0 : index
    %119 = vector.load %arg7[%c8_92, %c0_93] : memref<9x512xf32, #tpu.memory_space<vmem>>, vector<1x512xf32>
    %120 = vector.broadcast %119 : vector<1x512xf32> to vector<8x512xf32>
    %121 = arith.mulf %118, %120 : vector<8x512xf32>
    %c64_94 = arith.constant 64 : index
    %c0_95 = arith.constant 0 : index
    %122 = vector.load %arg10[%c64_94, %c0_95] : memref<72x512xf32, #tpu.memory_space<vmem>>, vector<8x512xf32>
    tpu.vector_store %arg10[%c64_94, %c0_95], %121 {strides = array<i32>} : memref<72x512xf32, #tpu.memory_space<vmem>>, vector<8x512xf32>,
    %c0_96 = arith.constant 0 : index
    %c0_97 = arith.constant 0 : index
    %123 = vector.load %arg2[%c0_96, %c0_97] : memref<8x72xf32, #tpu.memory_space<vmem>>, vector<8x72xf32>
    %c0_98 = arith.constant 0 : index
    %c0_99 = arith.constant 0 : index
    %124 = vector.load %arg10[%c0_98, %c0_99] : memref<72x512xf32, #tpu.memory_space<vmem>>, vector<72x512xf32>
    %cst_100 = arith.constant dense<0.000000e+00> : vector<8x512xf32>
    %125 = tpu.matmul %123, %124, %cst_100 {dimension_numbers = #tpu.dot_dimension_numbers<[1], [0], [0], [1], [0, 0, 1, 1], [], []>} : vector<8x72xf32>, vector<72x512xf32>, vector<8x512xf32> -> vector<8x512xf32>
    %c0_101 = arith.constant 0 : index
    %c0_102 = arith.constant 0 : index
    %126 = vector.load %arg11[%c0_101, %c0_102] : memref<8x512xf32, #tpu.memory_space<vmem>>, vector<8x512xf32>
    tpu.vector_store %arg11[%c0_101, %c0_102], %125 {strides = array<i32>} : memref<8x512xf32, #tpu.memory_space<vmem>>, vector<8x512xf32>,
    %c0_103 = arith.constant 0 : index
    %c0_104 = arith.constant 0 : index
    %127 = vector.load %arg11[%c0_103, %c0_104] : memref<8x512xf32, #tpu.memory_space<vmem>>, vector<8x512xf32>
    %cst_105 = arith.constant dense<0.000000e+00> : vector<8xf32>
    %128 = vector.multi_reduction <add>, %127, %cst_105 [1] : vector<8x512xf32> to vector<8xf32>
    %129 = vector.shape_cast %128 : vector<8xf32> to vector<8x1xf32>
    %cst_106 = arith.constant 0.001953125 : f32
    %130 = vector.broadcast %cst_106 : f32 to vector<8x1xf32>
    %131 = arith.mulf %129, %130 : vector<8x1xf32>
    %132 = vector.broadcast %131 : vector<8x1xf32> to vector<8x512xf32>
    %133 = arith.subf %127, %132 : vector<8x512xf32>
    %134 = arith.mulf %133, %133 : vector<8x512xf32>
    %cst_107 = arith.constant dense<0.000000e+00> : vector<8xf32>
    %135 = vector.multi_reduction <add>, %134, %cst_107 [1] : vector<8x512xf32> to vector<8xf32>
    %136 = vector.shape_cast %135 : vector<8xf32> to vector<8x1xf32>
    %cst_108 = arith.constant 0.001953125 : f32
    %137 = vector.broadcast %cst_108 : f32 to vector<8x1xf32>
    %138 = arith.mulf %136, %137 : vector<8x1xf32>
    %c0_109 = arith.constant 0 : index
    %c0_110 = arith.constant 0 : index
    %139 = vector.load %arg5[%c0_109, %c0_110] : memref<8x1xf32, #tpu.memory_space<vmem>>, vector<8x1xf32>
    %cst_111 = arith.constant 9.99999974E-6 : f32
    %140 = vector.broadcast %cst_111 : f32 to vector<8x1xf32>
    %141 = arith.addf %138, %140 : vector<8x1xf32>
    %142 = math.rsqrt %141 : vector<8x1xf32>
    %143 = arith.mulf %139, %142 : vector<8x1xf32>
    %c0_112 = arith.constant 0 : index
    %c0_113 = arith.constant 0 : index
    %144 = vector.load %arg6[%c0_112, %c0_113] : memref<8x1xf32, #tpu.memory_space<vmem>>, vector<8x1xf32>
    %145 = arith.mulf %131, %143 : vector<8x1xf32>
    %146 = arith.subf %144, %145 : vector<8x1xf32>
    %147 = vector.extract_strided_slice %143 {offsets = [0, 0], sizes = [4, 1], strides = [1, 1]} : vector<8x1xf32> to vector<4x1xf32>
    %148 = vector.extract_strided_slice %146 {offsets = [0, 0], sizes = [4, 1], strides = [1, 1]} : vector<8x1xf32> to vector<4x1xf32>
    %149 = vector.extract_strided_slice %127 {offsets = [0, 0], sizes = [4, 256], strides = [1, 1]} : vector<8x512xf32> to vector<4x256xf32>
    %150 = vector.broadcast %147 : vector<4x1xf32> to vector<4x256xf32>
    %151 = arith.mulf %149, %150 : vector<4x256xf32>
    %152 = vector.broadcast %148 : vector<4x1xf32> to vector<4x256xf32>
    %153 = arith.addf %151, %152 : vector<4x256xf32>
    %c0_114 = arith.constant 0 : index
    %c0_115 = arith.constant 0 : index
    %c0_116 = arith.constant 0 : index
    %154 = vector.load %arg0[%c0_114, %c0_115, %c0_116] : memref<2x4x256xf32, #tpu.memory_space<vmem>>, vector<1x4x256xf32>
    %155 = vector.shape_cast %154 : vector<1x4x256xf32> to vector<4x256xf32>
    %156 = arith.addf %153, %155 : vector<4x256xf32>
    %cst_117 = arith.constant 0.000000e+00 : f32
    %157 = vector.broadcast %cst_117 : f32 to vector<4x256xf32>
    %158 = arith.maximumf %156, %157 : vector<4x256xf32>
    %c0_118 = arith.constant 0 : index
    %c0_119 = arith.constant 0 : index
    %c0_120 = arith.constant 0 : index
    %159 = vector.load %arg8[%c0_118, %c0_119, %c0_120] : memref<2x4x256xf32, #tpu.memory_space<vmem>>, vector<1x4x256xf32>
    %160 = vector.shape_cast %159 : vector<1x4x256xf32> to vector<4x256xf32>
    %161 = vector.shape_cast %158 : vector<4x256xf32> to vector<1x4x256xf32>
    tpu.vector_store %arg8[%c0_118, %c0_119, %c0_120], %161 {strides = array<i32>} : memref<2x4x256xf32, #tpu.memory_space<vmem>>, vector<1x4x256xf32>,
    %162 = vector.extract_strided_slice %127 {offsets = [0, 256], sizes = [4, 256], strides = [1, 1]} : vector<8x512xf32> to vector<4x256xf32>
    %163 = vector.broadcast %147 : vector<4x1xf32> to vector<4x256xf32>
    %164 = arith.mulf %162, %163 : vector<4x256xf32>
    %165 = vector.broadcast %148 : vector<4x1xf32> to vector<4x256xf32>
    %166 = arith.addf %164, %165 : vector<4x256xf32>
    %c1_121 = arith.constant 1 : index
    %c0_122 = arith.constant 0 : index
    %c0_123 = arith.constant 0 : index
    %167 = vector.load %arg0[%c1_121, %c0_122, %c0_123] : memref<2x4x256xf32, #tpu.memory_space<vmem>>, vector<1x4x256xf32>
    %168 = vector.shape_cast %167 : vector<1x4x256xf32> to vector<4x256xf32>
    %169 = arith.addf %166, %168 : vector<4x256xf32>
    %cst_124 = arith.constant 0.000000e+00 : f32
    %170 = vector.broadcast %cst_124 : f32 to vector<4x256xf32>
    %171 = arith.maximumf %169, %170 : vector<4x256xf32>
    %c1_125 = arith.constant 1 : index
    %c0_126 = arith.constant 0 : index
    %c0_127 = arith.constant 0 : index
    %172 = vector.load %arg8[%c1_125, %c0_126, %c0_127] : memref<2x4x256xf32, #tpu.memory_space<vmem>>, vector<1x4x256xf32>
    %173 = vector.shape_cast %172 : vector<1x4x256xf32> to vector<4x256xf32>
    %174 = vector.shape_cast %171 : vector<4x256xf32> to vector<1x4x256xf32>
    tpu.vector_store %arg8[%c1_125, %c0_126, %c0_127], %174 {strides = array<i32>} : memref<2x4x256xf32, #tpu.memory_space<vmem>>, vector<1x4x256xf32>,
    return
  }
}

</mosaic_0001>

<bundles_post_ra>
// kernel: tpu_custom_call.1
= control target key start
LH: loop header
LB: loop body
LE: loop exit
PB: predicated region body
PF: predicated region fallthrough
CT: control target
= control target key end

     0   :  { %13 = vsyncpa [#allocation6], 0  ;;  %s1894_s0 = inlined_call_operand.vmem [shape: f32[2,4,256], index: 0, kind: input, shape index: {}]   ;;  %s1895_s1 = inlined_call_operand.vmem [shape: f32[8,72], index: 1, kind: input, shape index: {}]   ;;  %s1896_s2 = inlined_call_operand.vmem [shape: f32[8,72], index: 2, kind: input, shape index: {}]   ;;  %s1897_s3 = inlined_call_operand.vmem [shape: f32[8,1], index: 3, kind: input, shape index: {}]   ;;  %s1898_s4 = inlined_call_operand.vmem [shape: f32[8,1], index: 4, kind: input, shape index: {}]   ;;  %s1899_s5 = inlined_call_operand.vmem [shape: f32[8,1], index: 5, kind: input, shape index: {}]   ;;  %s1900_s6 = inlined_call_operand.vmem [shape: f32[8,1], index: 6, kind: input, shape index: {}]   ;;  %s1901_s7 = inlined_call_operand.hbm [shape: f32[9,512], index: 7, kind: input, shape index: {}]   ;;  %s1902_s8 = inlined_call_operand.hbm [shape: f32[2,4,256], index: 8, kind: output, shape index: {}]  }
   0x1   :  { %14 = vsyncpa [#allocation7], 0  ;;  %s1365_s27 = smov [#allocation5]  }
   0x2   :  { %s34_s28 = sshll.u32 %s1365_s27, 4  ;;  %s35_s28 = int_to_ptr.vmem [resolvable:$true] %s34_s28 }
   0x3   :  { %s1329_s29 = scalar_lea.vmem %s35_s28, 1024  ;;  %p1334_p1 = scmp.lt.s32.totalorder %s35_s28, %s35_s28 }
   0x4   :  { %p1330_p0 = scmp.ne.s32.totalorder %s35_s28, %s1329_s29  ;;  %p1335_p2 = scmp.lt.s32.totalorder %s1329_s29, %s1329_s29 }
   0x6   :  { %p1336_p3 = por %p1335_p2, %p1334_p1 }
   0x8   :  { %p1337_p4 = pnand %p1336_p3, %p1330_p0 }
   0xa   :  { %1340 = shalt.err (!%p1337_p4)
}
   0xb   :  { %s1366_s30 = smov 512   ;;  %s1367_s9 = smov 32  }
   0xc   :  { %40 = dma.hbm_to_vmem [thread:$0]  %s1901_s7, 1024, %s35_s28, [#allocation6], %s1366_s30, %s1366_s30, %s1367_s9  }
   0xd   :  { %1361 = dma.done.wait [#allocation6], 1024  }
   0xe   :  { %1362 = vsyncadd [#allocation6], 4294966272  ;;  %v1368_v0 = vmov 0.0   ;;  %v1289_v1 = vld [vmem:[%s1894_s0 + $0x8] sm:$0xff]  ;;  %v48_v2 = vld [vmem:[%s1894_s0] sm:$0xff]  ;;  %s1369_s15 = smov 111   ;;  %v73_v9 = vlaneseq }
   0xf   :  { %46 = vst [vmem:[#allocation2 + $0x18] sm:$0xf0] %v1368_v0  ;;  %44 = vst [vmem:[#allocation2 + $0x10] sm:$0xf0] %v1368_v0  ;;  %527 = vmatprep.mubr.f32.mxu0 %v1368_v0  ;;  %598 = vmatprep.mubr.f32.mxu1 %v1368_v0  ;;  %v50_v3 = vcombine.high %v48_v2, %v48_v2  ;;  %v57_v4 = vcombine.high %v1289_v1, %v1289_v1  ;;  %s1370_s16 = smov 112   ;;  %s1371_s17 = smov 113  }
  0x10   :  { %45 = vst [vmem:[#allocation2] sm:$0xf0] %v1368_v0  ;;  %47 = vst [vmem:[#allocation2 + $0x8] sm:$0xf0] %v1368_v0  ;;  %s1372_s18 = smov 127   ;;  %s1373_s19 = smov 1  }
  0x11   :  { %59 = vst [vmem:[#allocation2 + $0x18] sm:$0xf] %v1289_v1  ;;  %52 = vst [vmem:[#allocation2 + $0x10] sm:$0xf] %v48_v2  ;;  %s1374_s20 = smov 15   ;;  %s1375_s21 = smov 16  }
  0x12   :  { %53 = vst [vmem:[#allocation2] sm:$0xf] %v50_v3  ;;  %60 = vst [vmem:[#allocation2 + $0x8] sm:$0xf] %v57_v4  ;;  %s1376_s22 = smov 17   ;;  %v83_v10 = vshrl.u32 %v73_v9, 7 }
  0x13   :  { %v1513_v13 = vand.u32 127, %v73_v9  ;;  %v392_v16 = vld [vmem:[#allocation5 + $0x20] ss:$8 sm:$0xf]  ;;  %vm459_vm8 = vcmask 588800  }
  0x14   :  { %v1515_v14 = vsub.s32 0, %v83_v10  ;;  %v1517_v15 = vsub.s32 1, %v83_v10  ;;  %v1528_v25 = vsub.s32 2, %v83_v10  ;;  %v1530_v26 = vsub.s32 3, %v83_v10 }
  0x15   :  { %vm386_vm0 = vcmp.lt.s32.totalorder %v1513_v13, 111  ;;  %v348_v29 = vld [vmem:[#allocation5 + $0x7] ss:$8 sm:$0xf]  ;;  %vm298_vm1 = vcmp.lt.s32.totalorder %v1513_v13, 113  ;;  %vm342_vm2 = vcmp.lt.s32.totalorder %v1513_v13, 112 }
  0x16   :  { %v401_v19 = vrot.slane %v392_v16, %v1517_v15  ;;  %v397_v20 = vrot.slane %v392_v16, %v1515_v14  ;;  %v1532_v30 = vld [vmem:[#allocation5 + $0x6] ss:$8 sm:$0xf]  ;;  %v1536_v33 = vld [vmem:[#allocation5 + $0x5] ss:$8 sm:$0xf]  ;;  %v353_v34 = vrot.slane %v348_v29, %v1515_v14  ;;  %v357_v35 = vrot.slane %v348_v29, %v1517_v15 }
  0x17   :  { %v409_v36 = vrot.slane %v392_v16, %v1530_v26  ;;  %v405_v37 = vrot.slane %v392_v16, %v1528_v25  ;;  %v313_v38 = vrot.slane %v1532_v30, %v1517_v15  ;;  %v309_v39 = vrot.slane %v1532_v30, %v1515_v14  ;;  %v1578_v16 = vld [vmem:[#allocation5 + $0x3] ss:$8 sm:$0xf] }
  0x18   :  { %v1441_v5 = vld [vmem:[#allocation2 + $0x18] sm:$0xff]  ;;  %v1443_v6 = vld [vmem:[#allocation2 + $0x10] sm:$0xff]  ;;  %vm254_vm3 = vcmp.lt.s32.totalorder %v1513_v13, 127  ;;  %v269_v44 = vrot.slane %v1536_v33, %v1517_v15  ;;  %v361_v59 = vrot.slane %v348_v29, %v1528_v25  ;;  %v365_v60 = vrot.slane %v348_v29, %v1530_v26 }
  0x19   :  { %382 = vrot.lane.b32.xlu0 %v1441_v5, %s1369_s15  ;;  %378 = vrot.lane.b32.xlu1 %v1443_v6, %s1369_s15  ;;  %v1453_v7 = vld [vmem:[#allocation2] sm:$0xff]  ;;  %v1463_v8 = vld [vmem:[#allocation2 + $0x8] sm:$0xff]  ;;  %v265_v61 = vrot.slane %v1536_v33, %v1515_v14  ;;  %v317_v4 = vrot.slane %v1532_v30, %v1528_v25  ;;  %vm206_vm4 = vcmp.lt.s32.totalorder %v1513_v13, 1  ;;  %vm162_vm5 = vcmp.lt.s32.totalorder %v1513_v13, 15 }
  0x1a   :  { %vm118_vm6 = vcmp.lt.s32.totalorder %v1513_v13, 16  ;;  %vm75_vm7 = vcmp.lt.s32.totalorder %v1513_v13, 17 }
  0x1d   :  { %338 = vrot.lane.b32.xlu0 %v1441_v5, %s1370_s16  ;;  %334 = vrot.lane.b32.xlu1 %v1443_v6, %s1370_s16 }
  0x21   :  { %380 = vrot.lane.b32.xlu0 %v1453_v7, %s1369_s15  ;;  %294 = vrot.lane.b32.xlu1 %v1441_v5, %s1371_s17 }
  0x25   :  { %292 = vrot.lane.b32.xlu0 %v1453_v7, %s1371_s17  ;;  %290 = vrot.lane.b32.xlu1 %v1443_v6, %s1371_s17 }
  0x29   :  { %384 = vrot.lane.b32.xlu0 %v1463_v8, %s1369_s15  ;;  %336 = vrot.lane.b32.xlu1 %v1453_v7, %s1370_s16 }
  0x2d   :  { %248 = vrot.lane.b32.xlu0 %v1453_v7, %s1372_s18  ;;  %250 = vrot.lane.b32.xlu1 %v1441_v5, %s1372_s18 }
  0x31   :  { %340 = vrot.lane.b32.xlu0 %v1463_v8, %s1370_s16  ;;  %246 = vrot.lane.b32.xlu1 %v1443_v6, %s1372_s18 }
  0x35   :  { %296 = vrot.lane.b32.xlu0 %v1463_v8, %s1371_s17  ;;  %198 = vrot.lane.b32.xlu1 %v1443_v6, %s1373_s19 }
  0x39   :  { %200 = vrot.lane.b32.xlu0 %v1453_v7, %s1373_s19  ;;  %252 = vrot.lane.b32.xlu1 %v1463_v8, %s1372_s18 }
  0x3d   :  { %204 = vrot.lane.b32.xlu0 %v1463_v8, %s1373_s19  ;;  %154 = vrot.lane.b32.xlu1 %v1443_v6, %s1374_s20 }
  0x41   :  { %156 = vrot.lane.b32.xlu0 %v1453_v7, %s1374_s20  ;;  %160 = vrot.lane.b32.xlu1 %v1463_v8, %s1374_s20 }
  0x45   :  { %110 = vrot.lane.b32.xlu0 %v1443_v6, %s1375_s21  ;;  %112 = vrot.lane.b32.xlu1 %v1453_v7, %s1375_s21 }
  0x49   :  { %202 = vrot.lane.b32.xlu0 %v1441_v5, %s1373_s19  ;;  %116 = vrot.lane.b32.xlu1 %v1463_v8, %s1375_s21 }
  0x4d   :  { %65 = vrot.lane.b32.xlu0 %v1443_v6, %s1376_s22  ;;  %67 = vrot.lane.b32.xlu1 %v1453_v7, %s1376_s22 }
  0x51   :  { %158 = vrot.lane.b32.xlu0 %v1441_v5, %s1374_s20  ;;  %71 = vrot.lane.b32.xlu1 %v1463_v8, %s1376_s22 }
  0x55   :  { %114 = vrot.lane.b32.xlu0 %v1441_v5, %s1375_s21  ;;  %69 = vrot.lane.b32.xlu1 %v1441_v5, %s1376_s22 }
  0x8b   :  { %v383_v11 = vpop.permute.xlu0 %382  ;;  %v379_v12 = vpop.permute.xlu1 %378 }
  0x8f   :  { %v339_v17 = vpop.permute.xlu0 %338  ;;  %v335_v18 = vpop.permute.xlu1 %334 }
  0x93   :  { %v381_v21 = vpop.permute.xlu0 %380  ;;  %v1522_v22 = vpop.permute.xlu1 %294 }
  0x94   :  { %v389_v23 = vsel %vm386_vm0, %v379_v12, %v381_v21  ;;  %v388_v24 = vsel %vm386_vm0, %v381_v21, %v383_v11  ;;  %v221_v21 = vrot.slane %v1578_v16, %v1517_v15 }
  0x95   :  { %v415_v27 = vmul.f32 %v401_v19, %v388_v24  ;;  %v414_v28 = vmul.f32 %v397_v20, %v389_v23 }
  0x97   :  { %477 = vmatprep.subr.mxu0 %v415_v27  ;;  %v293_v31 = vpop.permute.xlu0 %292  ;;  %v291_v32 = vpop.permute.xlu1 %290  ;;  %v273_v27 = vrot.slane %v1536_v33, %v1528_v25 }
  0x98   :  { %478 = vmatpush1.msra.mxu0 %v414_v28  ;;  %v300_v40 = vsel %vm298_vm1, %v293_v31, %v1522_v22  ;;  %v301_v41 = vsel %vm298_vm1, %v291_v32, %v293_v31  ;;  %v277_v28 = vrot.slane %v1536_v33, %v1530_v26  ;;  %v217_v33 = vrot.slane %v1578_v16, %v1515_v14 }
  0x99   :  { %v327_v53 = vmul.f32 %v313_v38, %v300_v40  ;;  %v326_v56 = vmul.f32 %v309_v39, %v301_v41 }
  0x9b   :  { %v385_v42 = vpop.permute.xlu0 %384  ;;  %v337_v43 = vpop.permute.xlu1 %336 }
  0x9c   :  { %v387_v45 = vsel %vm386_vm0, %v383_v11, %v385_v42  ;;  %v344_v46 = vsel %vm342_vm2, %v337_v43, %v339_v17  ;;  %v345_v47 = vsel %vm342_vm2, %v335_v18, %v337_v43  ;;  %v390_v48 = vsel %vm386_vm0, %v385_v42, %v379_v12  ;;  %v1612_v42 = vld [vmem:[#allocation5 + $0x1] ss:$8 sm:$0xf] }
  0x9d   :  { %v370_v49 = vmul.f32 %v353_v34, %v345_v47  ;;  %v371_v50 = vmul.f32 %v357_v35, %v344_v46  ;;  %v417_v51 = vmul.f32 %v409_v36, %v390_v48  ;;  %v416_v52 = vmul.f32 %v405_v37, %v387_v45 }
  0x9e   :  { %v321_v12 = vrot.slane %v1532_v30, %v1530_v26 }
  0x9f   :  { %v249_v54 = vpop.permute.xlu0 %248  ;;  %479 = vmatprep.subr.mxu0 %v371_v50  ;;  %548 = vmatprep.subr.mxu1 %v417_v51  ;;  %v251_v55 = vpop.permute.xlu1 %250 }
  0xa0   :  { %v256_v57 = vsel %vm254_vm3, %v249_v54, %v251_v55  ;;  %480 = vmatpush1.msra.mxu0 %v370_v49  ;;  %549 = vmatpush1.msra.mxu1 %v416_v52  ;;  %v225_v52 = vrot.slane %v1578_v16, %v1528_v25 }
  0xa1   :  { %v283_v58 = vmul.f32 %v269_v44, %v256_v57  ;;  %481 = vmatprep.subr.mxu0 %v327_v53  ;;  %v229_v53 = vrot.slane %v1578_v16, %v1530_v26 }
  0xa2   :  { %482 = vmatpush1.msra.mxu0 %v326_v56 }
  0xa3   :  { %v341_v62 = vpop.permute.xlu0 %340  ;;  %483 = vmatprep.subr.mxu0 %v283_v58  ;;  %v247_v63 = vpop.permute.xlu1 %246 }
  0xa4   :  { %v343_v1 = vsel %vm342_vm2, %v339_v17, %v341_v62  ;;  %v346_v2 = vsel %vm342_vm2, %v341_v62, %v335_v18  ;;  %v257_v3 = vsel %vm254_vm3, %v247_v63, %v249_v54  ;;  %v129_v54 = vrot.slane %v1612_v42, %v1515_v14 }
  0xa5   :  { %v372_v9 = vmul.f32 %v361_v59, %v343_v1  ;;  %v373_v10 = vmul.f32 %v365_v60, %v346_v2  ;;  %v282_v11 = vmul.f32 %v265_v61, %v257_v3 }
  0xa7   :  { %v297_v19 = vpop.permute.xlu0 %296  ;;  %484 = vmatpush1.msra.mxu0 %v282_v11  ;;  %550 = vmatprep.subr.mxu1 %v373_v10  ;;  %v199_v17 = vpop.permute.xlu1 %198 }
  0xa8   :  { %v299_v18 = vsel %vm298_vm1, %v1522_v22, %v297_v19  ;;  %v302_v20 = vsel %vm298_vm1, %v297_v19, %v291_v32  ;;  %551 = vmatpush1.msra.mxu1 %v372_v9  ;;  %485 = vmatprep.subr.mxu0 %v1453_v7 }
  0xa9   :  { %v328_v23 = vmul.f32 %v317_v4, %v299_v18  ;;  %v329_v24 = vmul.f32 %v321_v12, %v302_v20  ;;  %486 = vmatpush1.msra.mxu0 %v1443_v6  ;;  %v1602_v6 = vld [vmem:[#allocation5 + $0x2] ss:$8 sm:$0xf] }
  0xaa   :  { %v177_v40 = vrot.slane %v1602_v6, %v1517_v15  ;;  %v173_v41 = vrot.slane %v1602_v6, %v1515_v14  ;;  %v181_v10 = vrot.slane %v1602_v6, %v1528_v25  ;;  %v185_v11 = vrot.slane %v1602_v6, %v1530_v26 }
  0xab   :  { %v201_v22 = vpop.permute.xlu0 %200  ;;  %552 = vmatprep.subr.mxu1 %v329_v24  ;;  %v253_v29 = vpop.permute.xlu1 %252 }
  0xac   :  { %v209_v30 = vsel %vm206_vm4, %v199_v17, %v201_v22  ;;  %v255_v31 = vsel %vm254_vm3, %v251_v55, %v253_v29  ;;  %v258_v7 = vsel %vm254_vm3, %v253_v29, %v247_v63  ;;  %553 = vmatpush1.msra.mxu1 %v328_v23  ;;  %v80_v55 = vld [vmem:[#allocation5] ss:$8 sm:$0xf] }
  0xad   :  { %v235_v32 = vmul.f32 %v221_v21, %v209_v30  ;;  %v284_v34 = vmul.f32 %v273_v27, %v255_v31  ;;  %v285_v35 = vmul.f32 %v277_v28, %v258_v7  ;;  %v89_v1 = vrot.slane %v80_v55, %v1517_v15 }
  0xae   :  { %v85_v12 = vrot.slane %v80_v55, %v1515_v14  ;;  %v137_v21 = vrot.slane %v1612_v42, %v1528_v25  ;;  %v141_v28 = vrot.slane %v1612_v42, %v1530_v26  ;;  %v97_v30 = vrot.slane %v80_v55, %v1530_v26 }
  0xaf   :  { %v205_v36 = vpop.permute.xlu0 %204  ;;  %487 = vmatprep.subr.mxu0 %v235_v32  ;;  %554 = vmatprep.subr.mxu1 %v285_v35  ;;  %v155_v37 = vpop.permute.xlu1 %154 }
  0xb0   :  { %v210_v38 = vsel %vm206_vm4, %v205_v36, %v199_v17  ;;  %555 = vmatpush1.msra.mxu1 %v284_v34  ;;  %v93_v34 = vrot.slane %v80_v55, %v1528_v25 }
  0xb1   :  { %v234_v39 = vmul.f32 %v217_v33, %v210_v38  ;;  %556 = vmatprep.subr.mxu1 %v1463_v8  ;;  %v133_v8 = vrot.slane %v1612_v42, %v1517_v15 }
  0xb2   :  { %557 = vmatpush1.msra.mxu1 %v1441_v5 }
  0xb3   :  { %v157_v43 = vpop.permute.xlu0 %156  ;;  %488 = vmatpush1.msra.mxu0 %v234_v39  ;;  %v161_v44 = vpop.permute.xlu1 %160 }
  0xb4   :  { %v165_v45 = vsel %vm162_vm5, %v155_v37, %v157_v43  ;;  %v166_v46 = vsel %vm162_vm5, %v161_v44, %v155_v37 }
  0xb5   :  { %v191_v47 = vmul.f32 %v177_v40, %v165_v45  ;;  %v190_v48 = vmul.f32 %v173_v41, %v166_v46 }
  0xb7   :  { %v111_v49 = vpop.permute.xlu0 %110  ;;  %489 = vmatprep.subr.mxu0 %v191_v47  ;;  %v113_v50 = vpop.permute.xlu1 %112 }
  0xb8   :  { %v121_v5 = vsel %vm118_vm6, %v111_v49, %v113_v50  ;;  %490 = vmatpush1.msra.mxu0 %v190_v48 }
  0xb9   :  { %v147_v51 = vmul.f32 %v133_v8, %v121_v5 }
  0xbb   :  { %v203_v56 = vpop.permute.xlu0 %202  ;;  %491 = vmatprep.subr.mxu0 %v147_v51  ;;  %v117_v57 = vpop.permute.xlu1 %116 }
  0xbc   :  { %v207_v58 = vsel %vm206_vm4, %v203_v56, %v205_v36  ;;  %v208_v59 = vsel %vm206_vm4, %v201_v22, %v203_v56  ;;  %v122_v60 = vsel %vm118_vm6, %v117_v57, %v111_v49  ;;  %v422_v22 = vld [vmem:[%s1895_s1] sm:$0xff]  ;;  %v1377_v56 = vmov 0  }
  0xbd   :  { %v236_v61 = vmul.f32 %v225_v52, %v208_v59  ;;  %v237_v62 = vmul.f32 %v229_v53, %v207_v58  ;;  %v146_v63 = vmul.f32 %v129_v54, %v122_v60  ;;  %1311 = vset.pattern.permute.xlu0 %v1377_v56  ;;  %1312 = vset.pattern.permute.xlu1 %v1377_v56  ;;  %v633_v60 = vld [vmem:[%s1897_s3] sm:$0xff] }
  0xbf   :  { %v66_v2 = vpop.permute.xlu0 %65  ;;  %492 = vmatpush1.msra.mxu0 %v146_v63  ;;  %558 = vmatprep.subr.mxu1 %v237_v62  ;;  %v68_v3 = vpop.permute.xlu1 %67  ;;  %v637_v63 = vld [vmem:[%s1898_s4] sm:$0xff] }
  0xc0   :  { %v78_v4 = vsel %vm75_vm7, %v66_v2, %v68_v3  ;;  %559 = vmatpush1.msra.mxu1 %v236_v61 }
  0xc1   :  { %v103_v9 = vmul.f32 %v89_v1, %v78_v4 }
  0xc3   :  { %v159_v16 = vpop.permute.xlu0 %158  ;;  %493 = vmatprep.subr.mxu0 %v103_v9  ;;  %v72_v19 = vpop.permute.xlu1 %71 }
  0xc4   :  { %v163_v17 = vsel %vm162_vm5, %v159_v16, %v161_v44  ;;  %v164_v18 = vsel %vm162_vm5, %v157_v43, %v159_v16  ;;  %v79_v20 = vsel %vm75_vm7, %v72_v19, %v66_v2 }
  0xc5   :  { %v192_v23 = vmul.f32 %v181_v10, %v164_v18  ;;  %v193_v24 = vmul.f32 %v185_v11, %v163_v17  ;;  %v102_v27 = vmul.f32 %v85_v12, %v79_v20 }
  0xc7   :  { %v115_v29 = vpop.permute.xlu0 %114  ;;  %494 = vmatpush1.msra.mxu0 %v102_v27  ;;  %560 = vmatprep.subr.mxu1 %v193_v24  ;;  %v70_v31 = vpop.permute.xlu1 %69  ;;  %v980_v27 = vld [vmem:[#allocation5 + $0x20] ss:$8 sm:$0xf] }
  0xc8   :  { %v119_v7 = vsel %vm118_vm6, %v115_v29, %v117_v57  ;;  %v120_v32 = vsel %vm118_vm6, %v113_v50, %v115_v29  ;;  %v76_v35 = vsel %vm75_vm7, %v70_v31, %v72_v19  ;;  %561 = vmatpush1.msra.mxu1 %v192_v23  ;;  %v77_v36 = vsel %vm75_vm7, %v68_v3, %v70_v31 }
  0xc9   :  { %v148_v33 = vmul.f32 %v137_v21, %v120_v32  ;;  %v149_v6 = vmul.f32 %v141_v28, %v119_v7  ;;  %1290 = vmatmul.mubr.msk.f32.vlgmr.msra.gmra.mxu0 %vm459_vm8, %v422_v22  ;;  %v105_v37 = vmul.f32 %v97_v30, %v76_v35  ;;  %v104_v38 = vmul.f32 %v93_v34, %v77_v36 }
  0xca   :  { %1114 = vmatprep.mubr.f32.mxu0 %v1368_v0  ;;  %v989_v29 = vrot.slane %v980_v27, %v1517_v15  ;;  %v985_v34 = vrot.slane %v980_v27, %v1515_v14  ;;  %v997_v35 = vrot.slane %v980_v27, %v1530_v26 }
  0xcb   :  { %562 = vmatprep.subr.mxu1 %v149_v6 }
  0xcc   :  { %563 = vmatpush1.msra.mxu1 %v148_v33  ;;  %v993_v33 = vrot.slane %v980_v27, %v1528_v25 }
  0xcd   :  { %564 = vmatprep.subr.mxu1 %v105_v37 }
  0xce   :  { %565 = vmatpush1.msra.mxu1 %v104_v38 }
  0xcf   :  { %1291 = vmatmul.mubr.msk.f32.vlgmr.msra.gmra.mxu1 %vm459_vm8, %v422_v22 }
  0xd0   :  { %1185 = vmatprep.mubr.f32.mxu1 %v1368_v0 }
 0x189   :  { %v529_v39 = vpop.f32.mrf.mxu0 }
 0x18b   :  { %v531_v40 = vpop.f32.mrf.mxu0 }
 0x18c   :  { %v613_v41 = vadd.f32 %v531_v40, %v529_v39 }
 0x18f   :  { %v600_v42 = vpop.f32.mrf.mxu1 }
 0x190   :  { %v614_v43 = vadd.f32 %v613_v41, %v600_v42 }
 0x191   :  { %v602_v44 = vpop.f32.mrf.mxu1 }
 0x192   :  { %v615_v45 = vadd.f32 %v614_v43, %v602_v44  ;;  %v938_v43 = vld [vmem:[#allocation5 + $0x7] ss:$8 sm:$0xf] }
 0x194   :  { %616 = vadd.xlane.f32.xlu0 %v615_v45 }
 0x21d   :  { %v617_v46 = vpop.xlane.xlu0 %616 }
 0x21e   :  { %v618_v47 = vmul.f32 0.001953125, %v617_v46  ;;  %v947_v46 = vrot.slane %v938_v43, %v1517_v15 }
 0x220   :  { %v619_v48 = vsub.f32 %v529_v39, %v618_v47  ;;  %v620_v8 = vsub.f32 %v531_v40, %v618_v47  ;;  %v621_v49 = vsub.f32 %v600_v42, %v618_v47  ;;  %v622_v50 = vsub.f32 %v602_v44, %v618_v47 }
 0x222   :  { %v623_v5 = vmul.f32 %v619_v48, %v619_v48  ;;  %v624_v51 = vmul.f32 %v620_v8, %v620_v8  ;;  %v625_v52 = vmul.f32 %v621_v49, %v621_v49  ;;  %v626_v54 = vmul.f32 %v622_v50, %v622_v50 }
 0x223   :  { %v943_v50 = vrot.slane %v938_v43, %v1515_v14 }
 0x224   :  { %v627_v53 = vadd.f32 %v624_v51, %v623_v5  ;;  %v955_v5 = vrot.slane %v938_v43, %v1530_v26  ;;  %v951_v51 = vrot.slane %v938_v43, %v1528_v25 }
 0x226   :  { %v628_v0 = vadd.f32 %v627_v53, %v625_v52  ;;  %v896_v52 = vld [vmem:[#allocation5 + $0x6] ss:$8 sm:$0xf] }
 0x228   :  { %v629_v55 = vadd.f32 %v628_v0, %v626_v54 }
 0x22a   :  { %630 = vadd.xlane.f32.xlu1 %v629_v55 }
 0x2b3   :  { %v631_v57 = vpop.xlane.xlu1 %630 }
 0x2b4   :  { %v632_v58 = vmul.f32 0.001953125, %v631_v57 }
 0x2b6   :  { %v634_v59 = vadd.f32 1e-05, %v632_v58 }
 0x2b8   :  { %1317 = vrsqrt.f32 %v634_v59  ;;  %v905_v59 = vrot.slane %v896_v52, %v1517_v15 }
 0x2c5   :  { %v1318_v61 = vpop.eup %1317 }
 0x2c6   :  { %v636_v62 = vmul.f32 %v1318_v61, %v633_v60 }
 0x2c8   :  { %642 = vperm.xlu0 %1311, %v636_v62   ;;  %v638_v1 = vmul.f32 %v636_v62, %v618_v47 }
 0x2ca   :  { %v639_v2 = vsub.f32 %v637_v63, %v638_v1 }
 0x2cc   :  { %651 = vperm.xlu1 %1312, %v639_v2   ;;  %v901_v2 = vrot.slane %v896_v52, %v1515_v14 }
 0x343   :  { %v643_v3 = vpop.permute.xlu0 %642 }
 0x344   :  { %v645_v4 = vmul.f32 %v643_v3, %v529_v39  ;;  %v646_v9 = vmul.f32 %v643_v3, %v531_v40  ;;  %v647_v10 = vmul.f32 %v643_v3, %v600_v42  ;;  %v648_v11 = vmul.f32 %v643_v3, %v602_v44 }
 0x345   :  { %v913_v3 = vrot.slane %v896_v52, %v1530_v26 }
 0x347   :  { %v652_v12 = vpop.permute.xlu1 %651 }
 0x348   :  { %v654_v16 = vadd.f32 %v652_v12, %v645_v4  ;;  %v655_v19 = vadd.f32 %v652_v12, %v646_v9  ;;  %v656_v17 = vadd.f32 %v652_v12, %v647_v10  ;;  %v657_v18 = vadd.f32 %v652_v12, %v648_v11  ;;  %v854_v9 = vld [vmem:[#allocation5 + $0x5] ss:$8 sm:$0xf] }
 0x349   :  { %v909_v4 = vrot.slane %v896_v52, %v1528_v25  ;;  %v863_v27 = vrot.slane %v854_v9, %v1517_v15 }
 0x34a   :  { %v1678_v20 = vmax.f32 %v654_v16, 0.0  ;;  %v1680_v21 = vmax.f32 %v655_v19, 0.0  ;;  %v1682_v23 = vmax.f32 %v656_v17, 0.0  ;;  %v1684_v24 = vmax.f32 %v657_v18, 0.0 }
 0x34c   :  { %662 = vst [vmem:[#allocation2 + $0x10] sm:$0xff] %v1678_v20  ;;  %663 = vst [vmem:[#allocation2] sm:$0xff] %v1680_v21  ;;  %886 = vrot.lane.b32.xlu0 %v1680_v21, %s1371_s17  ;;  %970 = vrot.lane.b32.xlu1 %v1680_v21, %s1369_s15 }
 0x34d   :  { %664 = vst [vmem:[#allocation2 + $0x18] sm:$0xff] %v1682_v23  ;;  %665 = vst [vmem:[#allocation2 + $0x8] sm:$0xff] %v1684_v24 }
 0x350   :  { %974 = vrot.lane.b32.xlu0 %v1684_v24, %s1369_s15  ;;  %972 = vrot.lane.b32.xlu1 %v1682_v23, %s1369_s15 }
 0x354   :  { %844 = vrot.lane.b32.xlu0 %v1680_v21, %s1372_s18  ;;  %968 = vrot.lane.b32.xlu1 %v1678_v20, %s1369_s15 }
 0x358   :  { %932 = vrot.lane.b32.xlu0 %v1684_v24, %s1370_s16  ;;  %928 = vrot.lane.b32.xlu1 %v1680_v21, %s1370_s16 }
 0x35c   :  { %890 = vrot.lane.b32.xlu0 %v1684_v24, %s1371_s17  ;;  %930 = vrot.lane.b32.xlu1 %v1682_v23, %s1370_s16 }
 0x360   :  { %798 = vrot.lane.b32.xlu0 %v1680_v21, %s1373_s19  ;;  %926 = vrot.lane.b32.xlu1 %v1678_v20, %s1370_s16 }
 0x364   :  { %802 = vrot.lane.b32.xlu0 %v1684_v24, %s1373_s19  ;;  %888 = vrot.lane.b32.xlu1 %v1682_v23, %s1371_s17 }
 0x368   :  { %756 = vrot.lane.b32.xlu0 %v1680_v21, %s1374_s20  ;;  %884 = vrot.lane.b32.xlu1 %v1678_v20, %s1371_s17 }
 0x36c   :  { %712 = vrot.lane.b32.xlu0 %v1678_v20, %s1375_s21  ;;  %846 = vrot.lane.b32.xlu1 %v1682_v23, %s1372_s18 }
 0x370   :  { %800 = vrot.lane.b32.xlu0 %v1682_v23, %s1373_s19  ;;  %842 = vrot.lane.b32.xlu1 %v1678_v20, %s1372_s18 }
 0x374   :  { %670 = vrot.lane.b32.xlu0 %v1678_v20, %s1376_s22  ;;  %796 = vrot.lane.b32.xlu1 %v1678_v20, %s1373_s19 }
 0x378   :  { %758 = vrot.lane.b32.xlu0 %v1682_v23, %s1374_s20  ;;  %848 = vrot.lane.b32.xlu1 %v1684_v24, %s1372_s18 }
 0x37c   :  { %716 = vrot.lane.b32.xlu0 %v1682_v23, %s1375_s21  ;;  %754 = vrot.lane.b32.xlu1 %v1678_v20, %s1374_s20 }
 0x380   :  { %760 = vrot.lane.b32.xlu1 %v1684_v24, %s1374_s20 }
 0x384   :  { %714 = vrot.lane.b32.xlu1 %v1680_v21, %s1375_s21 }
 0x388   :  { %718 = vrot.lane.b32.xlu1 %v1684_v24, %s1375_s21 }
 0x38c   :  { %672 = vrot.lane.b32.xlu1 %v1680_v21, %s1376_s22 }
 0x390   :  { %676 = vrot.lane.b32.xlu1 %v1684_v24, %s1376_s22 }
 0x394   :  { %674 = vrot.lane.b32.xlu1 %v1682_v23, %s1376_s22 }
 0x3be   :  { %v887_v28 = vpop.permute.xlu0 %886  ;;  %v971_v22 = vpop.permute.xlu1 %970 }
 0x3c2   :  { %v975_v30 = vpop.permute.xlu0 %974  ;;  %v973_v31 = vpop.permute.xlu1 %972 }
 0x3c3   :  { %v977_v7 = vsel %vm386_vm0, %v971_v22, %v973_v31  ;;  %v976_v6 = vsel %vm386_vm0, %v973_v31, %v975_v30 }
 0x3c4   :  { %v1003_v32 = vmul.f32 %v989_v29, %v977_v7  ;;  %v1004_v42 = vmul.f32 %v993_v33, %v976_v6 }
 0x3c6   :  { %v1762_v36 = vpop.permute.xlu0 %844  ;;  %1064 = vmatprep.subr.mxu0 %v1003_v32  ;;  %v969_v37 = vpop.permute.xlu1 %968 }
 0x3c7   :  { %v978_v38 = vsel %vm386_vm0, %v969_v37, %v971_v22  ;;  %v979_v39 = vsel %vm386_vm0, %v975_v30, %v969_v37 }
 0x3c8   :  { %v1002_v40 = vmul.f32 %v985_v34, %v978_v38  ;;  %v1005_v41 = vmul.f32 %v997_v35, %v979_v39  ;;  %v808_v34 = vld [vmem:[#allocation5 + $0x3] ss:$8 sm:$0xf] }
 0x3c9   :  { %v813_v37 = vrot.slane %v808_v34, %v1515_v14  ;;  %v817_v38 = vrot.slane %v808_v34, %v1517_v15 }
 0x3ca   :  { %v933_v44 = vpop.permute.xlu0 %932  ;;  %1065 = vmatpush1.msra.mxu0 %v1002_v40  ;;  %1135 = vmatprep.subr.mxu1 %v1005_v41  ;;  %v929_v45 = vpop.permute.xlu1 %928 }
 0x3cb   :  { %1136 = vmatpush1.msra.mxu1 %v1004_v42 }
 0x3ce   :  { %v891_v47 = vpop.permute.xlu0 %890  ;;  %v931_v48 = vpop.permute.xlu1 %930 }
 0x3cf   :  { %v935_v8 = vsel %vm342_vm2, %v929_v45, %v931_v48  ;;  %v934_v53 = vsel %vm342_vm2, %v931_v48, %v933_v44 }
 0x3d0   :  { %v961_v49 = vmul.f32 %v947_v46, %v935_v8  ;;  %v962_v60 = vmul.f32 %v951_v51, %v934_v53 }
 0x3d2   :  { %v1776_v54 = vpop.permute.xlu0 %798  ;;  %1066 = vmatprep.subr.mxu0 %v961_v49  ;;  %v927_v0 = vpop.permute.xlu1 %926 }
 0x3d3   :  { %v936_v55 = vsel %vm342_vm2, %v927_v0, %v929_v45  ;;  %v937_v56 = vsel %vm342_vm2, %v933_v44, %v927_v0  ;;  %v871_v44 = vrot.slane %v854_v9, %v1530_v26 }
 0x3d4   :  { %v960_v57 = vmul.f32 %v943_v50, %v936_v55  ;;  %v963_v58 = vmul.f32 %v955_v5, %v937_v56  ;;  %v821_v5 = vrot.slane %v808_v34, %v1528_v25 }
 0x3d6   :  { %v803_v61 = vpop.permute.xlu0 %802  ;;  %1067 = vmatpush1.msra.mxu0 %v960_v57  ;;  %1137 = vmatprep.subr.mxu1 %v963_v58  ;;  %v889_v62 = vpop.permute.xlu1 %888 }
 0x3d7   :  { %v893_v63 = vsel %vm298_vm1, %v887_v28, %v889_v62  ;;  %1138 = vmatpush1.msra.mxu1 %v962_v60  ;;  %v892_v10 = vsel %vm298_vm1, %v889_v62, %v891_v47 }
 0x3d8   :  { %v919_v1 = vmul.f32 %v905_v59, %v893_v63  ;;  %v920_v22 = vmul.f32 %v909_v4, %v892_v10 }
 0x3da   :  { %v1790_v11 = vpop.permute.xlu0 %756  ;;  %1068 = vmatprep.subr.mxu0 %v919_v1  ;;  %v885_v12 = vpop.permute.xlu1 %884 }
 0x3db   :  { %v894_v16 = vsel %vm298_vm1, %v885_v12, %v887_v28  ;;  %v895_v19 = vsel %vm298_vm1, %v891_v47, %v885_v12  ;;  %v859_v28 = vrot.slane %v854_v9, %v1515_v14  ;;  %v766_v47 = vld [vmem:[#allocation5 + $0x2] ss:$8 sm:$0xf] }
 0x3dc   :  { %v918_v17 = vmul.f32 %v901_v2, %v894_v16  ;;  %v921_v18 = vmul.f32 %v913_v3, %v895_v19  ;;  %v775_v50 = vrot.slane %v766_v47, %v1517_v15  ;;  %v771_v58 = vrot.slane %v766_v47, %v1515_v14 }
 0x3dd   :  { %v783_v59 = vrot.slane %v766_v47, %v1530_v26 }
 0x3de   :  { %v1797_v29 = vpop.permute.xlu0 %712  ;;  %1069 = vmatpush1.msra.mxu0 %v918_v17  ;;  %1139 = vmatprep.subr.mxu1 %v921_v18  ;;  %v847_v30 = vpop.permute.xlu1 %846  ;;  %v682_v18 = vld [vmem:[#allocation5] ss:$8 sm:$0xf] }
 0x3df   :  { %v851_v31 = vsel %vm254_vm3, %v1762_v36, %v847_v30  ;;  %1140 = vmatpush1.msra.mxu1 %v920_v22 }
 0x3e0   :  { %v877_v7 = vmul.f32 %v863_v27, %v851_v31 }
 0x3e2   :  { %1070 = vmatprep.subr.mxu0 %v877_v7  ;;  %v843_v32 = vpop.permute.xlu1 %842  ;;  %v801_v35 = vpop.permute.xlu0 %800 }
 0x3e3   :  { %v852_v33 = vsel %vm254_vm3, %v843_v32, %v1762_v36  ;;  %v867_v36 = vrot.slane %v854_v9, %v1528_v25  ;;  %v804_v51 = vsel %vm206_vm4, %v801_v35, %v803_v61  ;;  %v805_v52 = vsel %vm206_vm4, %v1776_v54, %v801_v35 }
 0x3e4   :  { %v876_v6 = vmul.f32 %v859_v28, %v852_v33  ;;  %v832_v60 = vmul.f32 %v821_v5, %v805_v52 }
 0x3e6   :  { %1071 = vmatpush1.msra.mxu0 %v876_v6  ;;  %v797_v39 = vpop.permute.xlu1 %796  ;;  %v1817_v45 = vpop.permute.xlu0 %670 }
 0x3e7   :  { %v806_v40 = vsel %vm206_vm4, %v797_v39, %v1776_v54  ;;  %v807_v41 = vsel %vm206_vm4, %v803_v61, %v797_v39  ;;  %1072 = vmatprep.subr.mxu0 %v1680_v21  ;;  %v825_v21 = vrot.slane %v808_v34, %v1530_v26  ;;  %v779_v61 = vrot.slane %v766_v47, %v1528_v25  ;;  %v724_v54 = vld [vmem:[#allocation5 + $0x1] ss:$8 sm:$0xf] }
 0x3e8   :  { %v830_v42 = vmul.f32 %v813_v37, %v807_v41  ;;  %v831_v43 = vmul.f32 %v817_v38, %v806_v40  ;;  %1073 = vmatpush1.msra.mxu0 %v1678_v20  ;;  %v733_v4 = vrot.slane %v724_v54, %v1517_v15  ;;  %v729_v12 = vrot.slane %v724_v54, %v1515_v14  ;;  %v1010_v41 = vld [vmem:[%s1896_s2] sm:$0xff] }
 0x3e9   :  { %v833_v56 = vmul.f32 %v825_v21, %v804_v51  ;;  %v741_v16 = vrot.slane %v724_v54, %v1530_v26  ;;  %v737_v17 = vrot.slane %v724_v54, %v1528_v25  ;;  %v687_v37 = vrot.slane %v682_v18, %v1515_v14 }
 0x3ea   :  { %1074 = vmatprep.subr.mxu0 %v831_v43  ;;  %v849_v46 = vpop.permute.xlu1 %848  ;;  %v759_v0 = vpop.permute.xlu0 %758  ;;  %v699_v40 = vrot.slane %v682_v18, %v1530_v26 }
 0x3eb   :  { %v850_v48 = vsel %vm254_vm3, %v847_v30, %v849_v46  ;;  %v853_v8 = vsel %vm254_vm3, %v849_v46, %v843_v32  ;;  %1075 = vmatpush1.msra.mxu0 %v830_v42  ;;  %v763_v62 = vsel %vm162_vm5, %v1790_v11, %v759_v0  ;;  %v691_v32 = vrot.slane %v682_v18, %v1517_v15 }
 0x3ec   :  { %v878_v49 = vmul.f32 %v867_v36, %v850_v48  ;;  %v879_v20 = vmul.f32 %v871_v44, %v853_v8  ;;  %v695_v15 = vrot.slane %v682_v18, %v1528_v25 }
 0x3ee   :  { %1141 = vmatprep.subr.mxu1 %v879_v20  ;;  %v755_v53 = vpop.permute.xlu1 %754  ;;  %v717_v19 = vpop.permute.xlu0 %716 }
 0x3ef   :  { %v764_v55 = vsel %vm162_vm5, %v755_v53, %v1790_v11  ;;  %1142 = vmatpush1.msra.mxu1 %v878_v49 }
 0x3f0   :  { %v789_v57 = vmul.f32 %v775_v50, %v764_v55  ;;  %1143 = vmatprep.subr.mxu1 %v1684_v24 }
 0x3f1   :  { %1144 = vmatpush1.msra.mxu1 %v1682_v23  ;;  %v790_v23 = vmul.f32 %v779_v61, %v763_v62  ;;  %v1220_v61 = vld [vmem:[%s1899_s5] sm:$0xff]  ;;  %s1378_s5 = smov [#allocation8]  }
 0x3f2   :  { %1076 = vmatprep.subr.mxu0 %v789_v57  ;;  %1145 = vmatprep.subr.mxu1 %v833_v56  ;;  %v761_v63 = vpop.permute.xlu1 %760 }
 0x3f3   :  { %v762_v24 = vsel %vm162_vm5, %v759_v0, %v761_v63  ;;  %v765_v1 = vsel %vm162_vm5, %v761_v63, %v755_v53  ;;  %1146 = vmatpush1.msra.mxu1 %v832_v60  ;;  %v1224_v63 = vld [vmem:[%s1900_s6] sm:$0xff]  ;;  %s1277_s6 = sshll.u32 %s1378_s5, 4  ;;  %s1278_s6 = int_to_ptr.vmem [resolvable:$true] %s1277_s6 }
 0x3f4   :  { %v788_v2 = vmul.f32 %v771_v58, %v765_v1  ;;  %v791_v3 = vmul.f32 %v783_v59, %v762_v24  ;;  %p1346_p6 = scmp.lt.s32.totalorder %s1278_s6, %s1278_s6 }
 0x3f6   :  { %1077 = vmatpush1.msra.mxu0 %v788_v2  ;;  %1147 = vmatprep.subr.mxu1 %v791_v3  ;;  %v715_v9 = vpop.permute.xlu1 %714  ;;  %v1241_v2 = vld [vmem:[%s1894_s0] sm:$0xff]  ;;  %v1294_v3 = vld [vmem:[%s1894_s0 + $0x8] sm:$0xff]  ;;  %s1341_s0 = scalar_lea.vmem %s1278_s6, 256 }
 0x3f7   :  { %v722_v10 = vsel %vm118_vm6, %v1797_v29, %v715_v9  ;;  %1148 = vmatpush1.msra.mxu1 %v790_v23  ;;  %v721_v27 = vsel %vm118_vm6, %v715_v9, %v717_v19  ;;  %v1243_v23 = vcombine.high %v1241_v2, %v1241_v2  ;;  %v1260_v9 = vcombine.high %v1294_v3, %v1294_v3  ;;  %p1342_p5 = scmp.ne.s32.totalorder %s1278_s6, %s1341_s0  ;;  %p1347_p7 = scmp.lt.s32.totalorder %s1341_s0, %s1341_s0 }
 0x3f8   :  { %v747_v11 = vmul.f32 %v733_v4, %v722_v10  ;;  %v748_v34 = vmul.f32 %v737_v17, %v721_v27 }
 0x3f9   :  { %p1348_p8 = por %p1347_p7, %p1346_p6 }
 0x3fa   :  { %1078 = vmatprep.subr.mxu0 %v747_v11  ;;  %v719_v22 = vpop.permute.xlu1 %718 }
 0x3fb   :  { %v720_v30 = vsel %vm118_vm6, %v717_v19, %v719_v22  ;;  %v723_v31 = vsel %vm118_vm6, %v719_v22, %v1797_v29  ;;  %p1349_p9 = pnand %p1348_p8, %p1342_p5 }
 0x3fc   :  { %v746_v7 = vmul.f32 %v729_v12, %v723_v31  ;;  %v749_v28 = vmul.f32 %v741_v16, %v720_v30 }
 0x3fe   :  { %1079 = vmatpush1.msra.mxu0 %v746_v7  ;;  %1149 = vmatprep.subr.mxu1 %v749_v28  ;;  %v673_v35 = vpop.permute.xlu1 %672 }
 0x3ff   :  { %v680_v33 = vsel %vm75_vm7, %v1817_v45, %v673_v35  ;;  %1150 = vmatpush1.msra.mxu1 %v748_v34 }
 0x400   :  { %v705_v6 = vmul.f32 %v691_v32, %v680_v33 }
 0x402   :  { %1080 = vmatprep.subr.mxu0 %v705_v6  ;;  %v677_v38 = vpop.permute.xlu1 %676 }
 0x403   :  { %v681_v29 = vsel %vm75_vm7, %v677_v38, %v1817_v45 }
 0x404   :  { %v704_v39 = vmul.f32 %v687_v37, %v681_v29 }
 0x406   :  { %1081 = vmatpush1.msra.mxu0 %v704_v39  ;;  %v675_v42 = vpop.permute.xlu1 %674 }
 0x407   :  { %v678_v14 = vsel %vm75_vm7, %v675_v42, %v677_v38  ;;  %v679_v43 = vsel %vm75_vm7, %v673_v35, %v675_v42  ;;  %1292 = vmatmul.mubr.msk.f32.vlgmr.msra.gmra.mxu0 %vm459_vm8, %v1010_v41 }
 0x408   :  { %v706_v36 = vmul.f32 %v695_v15, %v679_v43  ;;  %v707_v44 = vmul.f32 %v699_v40, %v678_v14 }
 0x40a   :  { %1151 = vmatprep.subr.mxu1 %v707_v44 }
 0x40b   :  { %1152 = vmatpush1.msra.mxu1 %v706_v36 }
 0x40c   :  { %1293 = vmatmul.mubr.msk.f32.vlgmr.msra.gmra.mxu1 %vm459_vm8, %v1010_v41 }
 0x4c7   :  { %v1116_v25 = vpop.f32.mrf.mxu0 }
 0x4c9   :  { %v1118_v26 = vpop.f32.mrf.mxu0 }
 0x4ca   :  { %v1200_v45 = vadd.f32 %v1118_v26, %v1116_v25 }
 0x4cc   :  { %v1187_v46 = vpop.f32.mrf.mxu1 }
 0x4cd   :  { %v1201_v47 = vadd.f32 %v1200_v45, %v1187_v46 }
 0x4ce   :  { %v1189_v48 = vpop.f32.mrf.mxu1 }
 0x4cf   :  { %v1202_v8 = vadd.f32 %v1201_v47, %v1189_v48 }
 0x4d1   :  { %1203 = vadd.xlane.f32.xlu0 %v1202_v8 }
 0x55a   :  { %v1204_v21 = vpop.xlane.xlu0 %1203 }
 0x55b   :  { %v1205_v49 = vmul.f32 0.001953125, %v1204_v21 }
 0x55d   :  { %v1206_v13 = vsub.f32 %v1116_v25, %v1205_v49  ;;  %v1207_v20 = vsub.f32 %v1118_v26, %v1205_v49  ;;  %v1208_v50 = vsub.f32 %v1187_v46, %v1205_v49  ;;  %v1209_v5 = vsub.f32 %v1189_v48, %v1205_v49 }
 0x55f   :  { %v1210_v51 = vmul.f32 %v1206_v13, %v1206_v13  ;;  %v1211_v52 = vmul.f32 %v1207_v20, %v1207_v20  ;;  %v1212_v53 = vmul.f32 %v1208_v50, %v1208_v50  ;;  %v1213_v55 = vmul.f32 %v1209_v5, %v1209_v5 }
 0x561   :  { %v1214_v0 = vadd.f32 %v1211_v52, %v1210_v51 }
 0x563   :  { %v1215_v56 = vadd.f32 %v1214_v0, %v1212_v53 }
 0x565   :  { %v1216_v57 = vadd.f32 %v1215_v56, %v1213_v55 }
 0x567   :  { %1217 = vadd.xlane.f32.xlu1 %v1216_v57 }
 0x5f0   :  { %v1218_v58 = vpop.xlane.xlu1 %1217 }
 0x5f1   :  { %v1219_v59 = vmul.f32 0.001953125, %v1218_v58 }
 0x5f3   :  { %v1221_v60 = vadd.f32 1e-05, %v1219_v59 }
 0x5f5   :  { %1319 = vrsqrt.f32 %v1221_v60 }
 0x602   :  { %v1320_v54 = vpop.eup %1319 }
 0x603   :  { %v1223_v62 = vmul.f32 %v1320_v54, %v1220_v61 }
 0x605   :  { %1229 = vperm.xlu0 %1311, %v1223_v62   ;;  %v1225_v24 = vmul.f32 %v1223_v62, %v1205_v49 }
 0x607   :  { %v1226_v1 = vsub.f32 %v1224_v63, %v1225_v24 }
 0x609   :  { %1236 = vperm.xlu1 %1312, %v1226_v1  }
 0x680   :  { %v1230_v4 = vpop.permute.xlu0 %1229 }
 0x681   :  { %v1232_v10 = vmul.f32 %v1230_v4, %v1116_v25  ;;  %v1233_v11 = vmul.f32 %v1230_v4, %v1118_v26  ;;  %v1254_v12 = vmul.f32 %v1230_v4, %v1187_v46  ;;  %v1255_v16 = vmul.f32 %v1230_v4, %v1189_v48 }
 0x684   :  { %v1237_v19 = vpop.permute.xlu1 %1236 }
 0x685   :  { %v1239_v17 = vadd.f32 %v1237_v19, %v1232_v10  ;;  %v1240_v18 = vadd.f32 %v1237_v19, %v1233_v11  ;;  %v1256_v27 = vadd.f32 %v1254_v12, %v1237_v19  ;;  %v1257_v22 = vadd.f32 %v1255_v16, %v1237_v19 }
 0x687   :  { %v1245_v30 = vadd.f32 %v1241_v2, %v1239_v17  ;;  %v1246_v31 = vadd.f32 %v1243_v23, %v1240_v18  ;;  %v1262_v7 = vadd.f32 %v1294_v3, %v1256_v27  ;;  %v1263_v28 = vadd.f32 %v1260_v9, %v1257_v22 }
 0x689   :  { %v1247_v32 = vmax.f32 %v1245_v30, 0.0  ;;  %v1248_v34 = vmax.f32 %v1246_v31, 0.0  ;;  %v1264_v35 = vmax.f32 %v1262_v7, 0.0  ;;  %v1265_v33 = vmax.f32 %v1263_v28, 0.0 }
 0x68b   :  { %v1251_v6 = vcombine.low %v1247_v32, %v1248_v34  ;;  %v1268_v37 = vcombine.low %v1264_v35, %v1265_v33 }
 0x68d   :  { %1253 = vst [vmem:[#allocation8] sm:$0xff] %v1251_v6  ;;  %1271 = vst [vmem:[#allocation8 + $0x8] sm:$0xff] %v1268_v37 }
 0x68e   :  { %1352 = shalt.err (!%p1349_p9)
}
 0x68f   :  { %s1379_s13 = smov 128   ;;  %s1380_s7 = smov 8  }
 0x690   :  { %1283 = dma.vmem_to_hbm [thread:$0]  %s1278_s6, 256, %s1902_s8, [#allocation7], %s1379_s13, %s1379_s13, %s1380_s7  }
 0x691   :  { %1363 = dma.done.wait [#allocation7], 256  }
 0x692   :  { %1364 = vsyncadd [#allocation7], 4294967040 }
 0x693   :  { %1287 = vsyncpa [#allocation6], 1 }
 0x694   :  { %1288 = vsyncpa [#allocation7], 1 }

</bundles_post_ra>
